<compile_context>
chip_gen: v6e
topology: v6e:2x2x1
jax: 0.10.0
libtpu: 0.0.40
codegen_flags: <defaults>
</compile_context>

<pallas_src>
from functools import partial

import jax
import jax.numpy as jnp
from jax.experimental import pallas as pl
from jax.experimental.pallas import tpu as pltpu


def _focal_loss_kernel(logits_ref, target_ref, at_ref, out_ref, *,
                       gamma, tail_rows):
    # logits_ref: (TN, C) float -> VMEM tile
    # target_ref: (TN, 1) int32 -> VMEM tile
    # at_ref    : (TN, 1) f32   -> VMEM tile (alpha[target], pre-gathered)
    # out_ref   : (1, 8, 128) f32 per-tile partial-sum block
    x = logits_ref[...].astype(jnp.float32)            # (TN, C)
    t = target_ref[...]                                # (TN, 1) int32
    at = at_ref[...].astype(jnp.float32)               # (TN, 1)

    # numerically stable log-sum-exp along the class axis (lanes)
    m = jnp.max(x, axis=1, keepdims=True)              # (TN, 1)
    lse = m + jnp.log(jnp.sum(jnp.exp(x - m), axis=1, keepdims=True))

    # logit of the target class via a one-hot mask; logpt = x_t - lse
    cls = jax.lax.broadcasted_iota(jnp.int32, x.shape, 1)       # (TN, C)
    onehot = (cls == t).astype(jnp.float32)                     # (TN, C)
    xt = jnp.sum(onehot * x, axis=1, keepdims=True)             # (TN, 1)
    logpt = xt - lse                                            # (TN, 1)
    pt = jnp.exp(logpt)                                         # (TN, 1)

    logpt_w = logpt * at                                        # (TN, 1)

    q = 1.0 - pt
    g = float(gamma)
    if g.is_integer() and 0.0 <= g <= 8.0:
        gi = int(g)
        # integer gamma (default 2.0): VPU multiply chain, EUP slot stays free
        focal = jnp.ones_like(q) if gi == 0 else q
        for _ in range(gi - 1):
            focal = focal * q
    else:
        # non-integer gamma: EUP exp/log fallback
        focal = q ** g

    loss = -(focal * logpt_w)                                   # (TN, 1)

    # lane-dense (8,128) output block: partial sum at [0,0], zeros elsewhere
    r = jax.lax.broadcasted_iota(jnp.int32, (8, 128), 0)
    c = jax.lax.broadcasted_iota(jnp.int32, (8, 128), 1)
    mask00 = (r == 0) & (c == 0)

    def _write(partial_sum):
        out_ref[0] = jnp.where(mask00, partial_sum, 0.0)

    if tail_rows == 0:
        # N is a multiple of the tile size: no masking anywhere (trace time)
        _write(jnp.sum(loss))
    else:
        i = pl.program_id(0)
        last = pl.num_programs(0) - 1

        @pl.when(i != last)
        def _full():
            _write(jnp.sum(loss))

        @pl.when(i == last)
        def _tail():
            # mask rows past N in the final partial tile only
            row = jax.lax.broadcasted_iota(jnp.int32, loss.shape, 0)
            _write(jnp.sum(jnp.where(row < tail_rows, loss, 0.0)))


def focal_loss(logits, target, gamma=2.0, alpha=None, size_average=True,
               block_rows=8192):
    """JAX/Pallas equivalent of FocalLoss.forward(input, target)."""
    N, C = logits.shape
    target = target.reshape(-1).astype(jnp.int32)

    # replicate the module's alpha handling; gather alpha[target] in XLA
    if alpha is None:
        at_vec = jnp.ones((N,), jnp.float32)
    else:
        if isinstance(alpha, (float, int)):
            # NOTE: matches the module only for C == 2 ([alpha, 1-alpha]);
            # for C > 2 the extra classes get weight 0 (PyTorch's gather would
            # raise an out-of-range error instead).
            alpha_vec = jnp.array([alpha, 1.0 - alpha], jnp.float32)
        else:
            alpha_vec = jnp.asarray(alpha, jnp.float32).reshape(-1)
        if alpha_vec.shape[0] < C:
            alpha_vec = jnp.concatenate(
                [alpha_vec, jnp.zeros((C - alpha_vec.shape[0],), jnp.float32)])
        alpha_vec = alpha_vec[:C]
        at_vec = alpha_vec[target]            # (N,)-sized gather, negligible

    target2d = target.reshape(-1, 1)
    at2d = at_vec.reshape(-1, 1).astype(jnp.float32)

    # Row-tile sizing: as large as possible while the double-buffered VMEM
    # footprint (lane-padded logits + target + at) stays within ~24 MiB.
    lane_c = pl.cdiv(C, 128) * 128
    row_bytes = 2 * (lane_c * jnp.dtype(logits.dtype).itemsize + 512 + 512)
    vmem_budget = 24 * 1024 * 1024
    tn_cap = max(8, int(vmem_budget // row_bytes) // 8 * 8)
    if N <= min(block_rows, tn_cap):
        tn = N
    else:
        tn = max(8, min(block_rows, tn_cap) // 8 * 8)
    num_tiles = pl.cdiv(N, tn)
    tail_rows = N % tn   # 0 when N divides evenly (incl. single-tile path)

    kernel = partial(_focal_loss_kernel, gamma=float(gamma),
                     tail_rows=tail_rows)

    out = pl.pallas_call(
        kernel,
        out_shape=jax.ShapeDtypeStruct((num_tiles, 8, 128), jnp.float32),
        grid_spec=pltpu.PrefetchScalarGridSpec(
            num_scalar_prefetch=0,
            grid=(num_tiles,),
            in_specs=[
                pl.BlockSpec((tn, C), lambda i: (i, 0)),   # logits tile
                pl.BlockSpec((tn, 1), lambda i: (i, 0)),   # target tile
                pl.BlockSpec((tn, 1), lambda i: (i, 0)),   # alpha[target] tile
            ],
            out_specs=pl.BlockSpec((1, 8, 128), lambda i: (i, 0, 0)),
        ),
        compiler_params=pltpu.CompilerParams(
            dimension_semantics=("parallel",),      # independent tiles -> 2 TCs on v7x
            vmem_limit_bytes=48 * 1024 * 1024),
    )(logits, target2d, at2d)

    total = jnp.sum(out)       # only [i, 0, 0] is non-zero per tile
    if size_average:
        return total / N
    return total


def _focal_loss_ref(logits, target, gamma=2.0, alpha=None, size_average=True):
    """Pure-JAX reference mirroring the PyTorch module."""
    logp = jax.nn.log_softmax(logits.astype(jnp.float32), axis=1)
    logpt = jnp.take_along_axis(logp, target.reshape(-1, 1), axis=1).reshape(-1)
    pt = jnp.exp(logpt)
    if alpha is not None:
        if isinstance(alpha, (float, int)):
            a = jnp.array([alpha, 1.0 - alpha], jnp.float32)
        else:
            a = jnp.asarray(alpha, jnp.float32)
        at = a[target.reshape(-1)]
        logpt = logpt * at
    loss = -1.0 * (1.0 - pt) ** gamma * logpt
    return loss.mean() if size_average else loss.sum()


if __name__ == "__main__":
    key = jax.random.PRNGKey(0)
    k1, k2, k3, k4 = jax.random.split(key, 4)

    # case 1: default module config (gamma=2.0, alpha=None, size_average=True),
    #         single-tile path
    N1, C1 = 8, 16
    logits1 = jax.random.normal(k1, (N1, C1), dtype=jnp.float32)
    target1 = jax.random.randint(k2, (N1,), 0, C1, dtype=jnp.int32)
    out1 = focal_loss(logits1, target1, gamma=2.0, alpha=None, size_average=True)
    jax.block_until_ready(out1)
    ref1 = _focal_loss_ref(logits1, target1, gamma=2.0, alpha=None,
                           size_average=True)
    assert jnp.allclose(out1, ref1, rtol=1e-5, atol=1e-5), (out1, ref1)

    # case 2: multi-tile path with a partial last tile (N not a multiple of TN),
    #         per-class list alpha (C=7 like HAM10000), sum reduction
    N2, C2 = 200, 7
    logits2 = jax.random.normal(k3, (N2, C2), dtype=jnp.float32)
    target2 = jax.random.randint(k4, (N2,), 0, C2, dtype=jnp.int32)
    alpha_list = [0.5 + 0.05 * i for i in range(C2)]
    out2 = focal_loss(logits2, target2, gamma=2.0, alpha=alpha_list,
                      size_average=False, block_rows=64)
    jax.block_until_ready(out2)
    ref2 = _focal_loss_ref(logits2, target2, gamma=2.0, alpha=alpha_list,
                           size_average=False)
    assert jnp.allclose(out2, ref2, rtol=1e-5, atol=1e-4), (out2, ref2)

    # case 3: non-integer gamma exercises the jnp.power fallback path
    out3 = focal_loss(logits1, target1, gamma=1.5, alpha=None, size_average=True)
    jax.block_until_ready(out3)
    ref3 = _focal_loss_ref(logits1, target1, gamma=1.5, alpha=None,
                           size_average=True)
    assert jnp.allclose(out3, ref3, rtol=1e-5, atol=1e-5), (out3, ref3)

    # case 4: bf16 logits straight from HBM (kernel upcasts in-VMEM)
    logits4 = logits2.astype(jnp.bfloat16)
    out4 = focal_loss(logits4, target2, gamma=2.0, alpha=None,
                      size_average=True, block_rows=64)
    jax.block_until_ready(out4)
    ref4 = _focal_loss_ref(logits4, target2, gamma=2.0, alpha=None,
                           size_average=True)
    assert jnp.allclose(out4, ref4, rtol=1e-4, atol=1e-4), (out4, ref4)

    print("KERNEL_OK")
</pallas_src>

<mosaic_0001>
module attributes {stable_mosaic.version = 11 : i64} {
  func.func @_focal_loss_kernel(%arg0: i32, %arg1: memref<8x16xf32, #tpu.memory_space<vmem>>, %arg2: memref<8x1xi32, #tpu.memory_space<vmem>>, %arg3: memref<8x1xf32, #tpu.memory_space<vmem>>, %arg4: memref<1x8x128xf32, #tpu.memory_space<vmem>>) attributes {dimension_semantics = [#tpu.dimension_semantics<parallel>], iteration_bounds = array<i64: 1>, scalar_prefetch = 0 : i64, scratch_operands = 0 : i64, tpu.core_type = #tpu.core_type<tc>, window_params = [{transform_indices = @transform_0, window_bounds = array<i64: 8, 16>}, {transform_indices = @transform_1, window_bounds = array<i64: 8, 1>}, {transform_indices = @transform_2, window_bounds = array<i64: 8, 1>}, {transform_indices = @transform_3, window_bounds = array<i64: 1, 8, 128>}]} {
    %c0 = arith.constant 0 : index
    %c0_0 = arith.constant 0 : index
    %0 = vector.load %arg1[%c0, %c0_0] : memref<8x16xf32, #tpu.memory_space<vmem>>, vector<8x16xf32>
    %c0_1 = arith.constant 0 : index
    %c0_2 = arith.constant 0 : index
    %1 = vector.load %arg2[%c0_1, %c0_2] : memref<8x1xi32, #tpu.memory_space<vmem>>, vector<8x1xi32>
    %c0_3 = arith.constant 0 : index
    %c0_4 = arith.constant 0 : index
    %2 = vector.load %arg3[%c0_3, %c0_4] : memref<8x1xf32, #tpu.memory_space<vmem>>, vector<8x1xf32>
    %cst = arith.constant dense<0xFF800000> : vector<8xf32>
    %3 = vector.multi_reduction <maximumf>, %0, %cst [1] : vector<8x16xf32> to vector<8xf32>
    %4 = vector.shape_cast %3 : vector<8xf32> to vector<8x1xf32>
    %5 = vector.broadcast %4 : vector<8x1xf32> to vector<8x16xf32>
    %6 = arith.subf %0, %5 : vector<8x16xf32>
    %7 = math.exp %6 : vector<8x16xf32>
    %cst_5 = arith.constant dense<0.000000e+00> : vector<8xf32>
    %8 = vector.multi_reduction <add>, %7, %cst_5 [1] : vector<8x16xf32> to vector<8xf32>
    %9 = vector.shape_cast %8 : vector<8xf32> to vector<8x1xf32>
    %10 = math.log %9 : vector<8x1xf32>
    %11 = arith.addf %4, %10 : vector<8x1xf32>
    %12 = tpu.iota {dimensions = array<i32: 1>} : vector<8x16xi32>
    %13 = vector.broadcast %1 : vector<8x1xi32> to vector<8x16xi32>
    %14 = arith.cmpi eq, %12, %13 : vector<8x16xi32>
    %15 = arith.extui %14 : vector<8x16xi1> to vector<8x16xi32>
    %16 = arith.sitofp %15 : vector<8x16xi32> to vector<8x16xf32>
    %17 = arith.mulf %16, %0 : vector<8x16xf32>
    %cst_6 = arith.constant dense<0.000000e+00> : vector<8xf32>
    %18 = vector.multi_reduction <add>, %17, %cst_6 [1] : vector<8x16xf32> to vector<8xf32>
    %19 = vector.shape_cast %18 : vector<8xf32> to vector<8x1xf32>
    %20 = arith.subf %19, %11 : vector<8x1xf32>
    %21 = math.exp %20 : vector<8x1xf32>
    %22 = arith.mulf %20, %2 : vector<8x1xf32>
    %cst_7 = arith.constant 1.000000e+00 : f32
    %23 = vector.broadcast %cst_7 : f32 to vector<8x1xf32>
    %24 = arith.subf %23, %21 : vector<8x1xf32>
    %25 = arith.mulf %24, %24 : vector<8x1xf32>
    %26 = arith.mulf %25, %22 : vector<8x1xf32>
    %cst_8 = arith.constant 0.000000e+00 : f32
    %27 = vector.broadcast %cst_8 : f32 to vector<8x1xf32>
    %28 = arith.subf %27, %26 : vector<8x1xf32>
    %29 = tpu.iota {dimensions = array<i32: 0>} : vector<8x128xi32>
    %30 = tpu.iota {dimensions = array<i32: 1>} : vector<8x128xi32>
    %c0_i32 = arith.constant 0 : i32
    %31 = vector.broadcast %c0_i32 : i32 to vector<8x128xi32>
    %32 = arith.cmpi eq, %29, %31 : vector<8x128xi32>
    %c0_i32_9 = arith.constant 0 : i32
    %33 = vector.broadcast %c0_i32_9 : i32 to vector<8x128xi32>
    %34 = arith.cmpi eq, %30, %33 : vector<8x128xi32>
    %35 = arith.andi %32, %34 : vector<8x128xi1>
    %36 = vector.shape_cast %28 : vector<8x1xf32> to vector<1x8x1xf32>
    %cst_10 = arith.constant dense<0.000000e+00> : vector<1xf32>
    %37 = vector.multi_reduction <add>, %36, %cst_10 [1, 2] : vector<1x8x1xf32> to vector<1xf32>
    %38 = vector.shape_cast %37 : vector<1xf32> to vector<1x1x1xf32>
    %39 = vector.extract %38[0, 0, 0] : f32 from vector<1x1x1xf32>
    %cst_11 = arith.constant 0.000000e+00 : f32
    %40 = vector.broadcast %39 : f32 to vector<8x128xf32>
    %41 = vector.broadcast %cst_11 : f32 to vector<8x128xf32>
    %42 = arith.select %35, %40, %41 : vector<8x128xi1>, vector<8x128xf32>
    %c0_12 = arith.constant 0 : index
    %c0_13 = arith.constant 0 : index
    %c0_14 = arith.constant 0 : index
    %43 = vector.load %arg4[%c0_12, %c0_13, %c0_14] : memref<1x8x128xf32, #tpu.memory_space<vmem>>, vector<1x8x128xf32>
    %44 = vector.shape_cast %43 : vector<1x8x128xf32> to vector<8x128xf32>
    %45 = vector.shape_cast %42 : vector<8x128xf32> to vector<1x8x128xf32>
    tpu.vector_store %arg4[%c0_12, %c0_13, %c0_14], %45 {strides = array<i32>} : memref<1x8x128xf32, #tpu.memory_space<vmem>>, vector<1x8x128xf32>,
    return
  }
  func.func @transform_0(%arg0: i32) -> (i32, i32) {
    %c0_i32 = arith.constant 0 : i32
    %c0_i32_0 = arith.constant 0 : i32
    return %arg0, %c0_i32 : i32, i32
  }
  func.func @transform_1(%arg0: i32) -> (i32, i32) {
    %c0_i32 = arith.constant 0 : i32
    %c0_i32_0 = arith.constant 0 : i32
    return %arg0, %c0_i32 : i32, i32
  }
  func.func @transform_2(%arg0: i32) -> (i32, i32) {
    %c0_i32 = arith.constant 0 : i32
    %c0_i32_0 = arith.constant 0 : i32
    return %arg0, %c0_i32 : i32, i32
  }
  func.func @transform_3(%arg0: i32) -> (i32, i32, i32) {
    %c0_i32 = arith.constant 0 : i32
    %c0_i32_0 = arith.constant 0 : i32
    %c0_i32_1 = arith.constant 0 : i32
    return %arg0, %c0_i32, %c0_i32_0 : i32, i32, i32
  }
}

</mosaic_0001>

<bundles_post_ra>
// kernel: tpu_custom_call.1
= control target key start
LH: loop header
LB: loop body
LE: loop exit
PB: predicated region body
PF: predicated region fallthrough
CT: control target
= control target key end

     0   :  { %vm18_vm0 = vcmask 130048   ;;  %s157_s0 = inlined_call_operand.vmem [shape: f32[8,16], index: 0, kind: input, shape index: {}]   ;;  %s158_s1 = inlined_call_operand.vmem [shape: s32[8,1], index: 1, kind: input, shape index: {}]   ;;  %s159_s2 = inlined_call_operand.vmem [shape: f32[8,1], index: 2, kind: input, shape index: {}]   ;;  %s160_s3 = inlined_call_operand.hbm [shape: f32[1,8,128], index: 3, kind: output, shape index: {}]  }
   0x1   :  { %v15_v0 = vld [vmem:[%s157_s0] sm:$0xff] }
   0x2   :  { %8 = vsyncpa [#allocation3], 0  ;;  %v19_v1 = vsel %vm18_vm0, %v15_v0, -inf  ;;  %v119_v2 = vmov 0   ;;  %v16_v3 = vld [vmem:[%s158_s1] sm:$0xff]  ;;  %v31_v7 = vlaneseq  ;;  %v120_v10 = vmov 0.0  }
   0x3   :  { %90 = vset.pattern.permute.xlu0 %v119_v2  ;;  %v17_v24 = vld [vmem:[%s159_s2] sm:$0xff]  ;;  %vm56_vm2 = vcmask 7168   ;;  %s121_s2 = smov [#allocation2]  }
   0x4   :  { %20 = vmax.xlane.f32.xlu0 %v19_v1  ;;  %v32_v8 = vand.u32 127, %v31_v7  ;;  %v52_v38 = vshrl.u32 %v31_v7, 7  ;;  %s76_s16 = sshll.u32 %s121_s2, 4  ;;  %s77_s16 = int_to_ptr.vmem [resolvable:$true] %s76_s16 }
   0x5   :  { %s97_s18 = scalar_lea.vmem %s77_s16, 128  ;;  %p102_p1 = scmp.lt.s32.totalorder %s77_s16, %s77_s16 }
   0x6   :  { %vm53_vm3 = vcmp.eq.s32.totalorder %v52_v38, 0  ;;  %vm54_vm4 = vcmp.eq.s32.totalorder %v32_v8, 0  ;;  %p98_p0 = scmp.ne.s32.totalorder %s77_s16, %s97_s18  ;;  %p103_p2 = scmp.lt.s32.totalorder %s97_s18, %s97_s18 }
   0x7   :  { %vm55_vm5 = vmand %vm53_vm3, %vm54_vm4 }
   0x8   :  { %p104_p3 = por %p103_p2, %p102_p1 }
   0xa   :  { %p105_p4 = pnand %p104_p3, %p98_p0 }
  0x1a   :  { %34 = vperm.xlu0 %90, %v16_v3  }
  0x8d   :  { %v21_v4 = vpop.xlane.xlu0 %20 }
  0x8e   :  { %v22_v5 = vsub.f32 %v15_v0, %v21_v4 }
  0x90   :  { %v23_v6 = vmul.f32 1.442695, %v22_v5 }
  0x92   :  { %91 = vpow2.f32 %v23_v6 }
  0x95   :  { %v35_v9 = vpop.permute.xlu0 %34 }
  0x96   :  { %vm36_vm1 = vcmp.eq.s32.totalorder %v32_v8, %v35_v9 }
  0x97   :  { %v84_v11 = vsel %vm36_vm1, 1.0, %v120_v10 }
  0x98   :  { %v39_v12 = vmul.f32 %v84_v11, %v15_v0 }
  0x9a   :  { %v40_v15 = vsel %vm18_vm0, %v39_v12, 0.0 }
  0x9f   :  { %v92_v13 = vpop.eup %91 }
  0xa0   :  { %v25_v14 = vsel %vm18_vm0, %v92_v13, 0.0 }
  0xa1   :  { %26 = vadd.xlane.f32.xlu1 %v25_v14 }
  0xa5   :  { %41 = vadd.xlane.f32.xlu1 %v40_v15 }
 0x12a   :  { %v27_v16 = vpop.xlane.xlu1 %26 }
 0x12b   :  { %93 = vlog2.f32 %v27_v16 }
 0x12e   :  { %v42_v19 = vpop.xlane.xlu1 %41 }
 0x138   :  { %v94_v17 = vpop.eup %93 }
 0x139   :  { %v29_v18 = vmul.f32 0.6931472, %v94_v17 }
 0x13b   :  { %v30_v20 = vadd.f32 %v29_v18, %v21_v4 }
 0x13d   :  { %v43_v21 = vsub.f32 %v42_v19, %v30_v20 }
 0x13f   :  { %v44_v22 = vmul.f32 1.442695, %v43_v21  ;;  %v46_v26 = vmul.f32 %v43_v21, %v17_v24 }
 0x141   :  { %95 = vpow2.f32 %v44_v22 }
 0x14e   :  { %v96_v23 = vpop.eup %95 }
 0x14f   :  { %v47_v25 = vsub.f32 1.0, %v96_v23 }
 0x151   :  { %v48_v27 = vmul.f32 %v47_v25, %v47_v25 }
 0x153   :  { %v49_v28 = vmul.f32 %v48_v27, %v46_v26 }
 0x155   :  { %v50_v29 = vsub.f32 0.0, %v49_v28 }
 0x157   :  { %v57_v30 = vsel %vm56_vm2, %v50_v29, 0.0 }
 0x158   :  { %58 = vadd.xlane.f32.xlu1 %v57_v30 }
 0x1e1   :  { %v59_v31 = vpop.xlane.xlu1 %58 }
 0x1e2   :  { %v60_v32 = vrot.slane %v59_v31, 4 }
 0x1e4   :  { %v61_v33 = vadd.f32 %v60_v32, %v59_v31 }
 0x1e6   :  { %v62_v34 = vrot.slane %v61_v33, 2 }
 0x1e8   :  { %v63_v35 = vadd.f32 %v62_v34, %v61_v33 }
 0x1ea   :  { %v64_v36 = vrot.slane %v63_v35, 1 }
 0x1ec   :  { %v65_v37 = vadd.f32 %v64_v36, %v63_v35 }
 0x1ee   :  { %85 = vpush %v65_v37 }
 0x21f   :  { %s86_s17 = spop %85 }
 0x220   :  { %v67_v39 = vstv %s86_s17 }
 0x221   :  { %v68_v40 = vsel %vm55_vm5, %v67_v39, 0.0 }
 0x222   :  { %69 = vst [vmem:[#allocation2] sm:$0xff] %v68_v40 }
 0x223   :  { %108 = shalt.err (!%p105_p4)
}
 0x224   :  { %79 = dma.vmem_to_hbm [thread:$0]  %s77_s16, 128, %s160_s3, [#allocation3]  }
 0x225   :  { %117 = dma.done.wait [#allocation3], 128  }
 0x226   :  { %118 = vsyncadd [#allocation3], 4294967168 }
 0x227   :  { %83 = vsyncpa [#allocation3], 1 }

</bundles_post_ra>
